<compile_context>
chip_gen: v5e
topology: v5e:2x2
jax: 0.10.0
libtpu: 0.0.40
codegen_flags: <defaults>
</compile_context>

<pallas_src>
import jax
import jax.numpy as jnp
from jax.experimental import pallas as pl
from jax.experimental.pallas import tpu as pltpu


# ----------------------------------------------------------------------------
# Banded conv weights: encode the 3 kw taps + zero 'same' padding along W.
# ----------------------------------------------------------------------------
def make_banded_weights(w_hwio, width):
    """(KH, KW, Cin, Cout) HWIO conv weight -> (KH, width*Cin, width*Cout).

    band[kh, ws*Cin + ci, w*Cout + co] = w_hwio[kh, kw, ci, co] with
    ws = w + kw - pad; out-of-range ws entries stay zero, implementing the
    'same' zero padding along W.  Padding along H is handled by halo rows in
    VMEM scratch.  Vectorized: one shifted-identity einsum per kw tap (3 ops)
    instead of 3*W chained .at[].set updates.
    """
    kh_taps, kw_taps, cin, cout = w_hwio.shape
    pad = (kw_taps - 1) // 2
    band = jnp.zeros((kh_taps, width * cin, width * cout), w_hwio.dtype)
    for kw in range(kw_taps):
        shifted_eye = jnp.eye(width, k=pad - kw, dtype=w_hwio.dtype)
        band = band + jnp.einsum(
            "sw,kio->ksiwo", shifted_eye, w_hwio[:, kw]
        ).reshape(kh_taps, width * cin, width * cout)
    return band


# ----------------------------------------------------------------------------
# Pallas kernel: fused DoubleConv  (conv3x3 -> folded-BN -> ReLU) x 2
# ----------------------------------------------------------------------------
def double_conv_pallas(up_nhwc, skip_nhwc, w1, s1, b1, w2, s2, b2):
    """up/skip: (N, H, W, C*) float32 -> (N, H, W, Cout) float32.

    The channel concat of `up` and `skip` is fused into the kernel: conv1's
    banded weights are built per part and concatenated along K, and both parts
    are written into one padded scratch -> the concatenated tensor never exists
    in HBM.
    """
    N, H, W, Cprev = up_nhwc.shape
    Cskip = skip_nhwc.shape[-1]
    Cmid = w1.shape[-1]
    Cout = w2.shape[-1]
    Ku, Ks = W * Cprev, W * Cskip
    Kin, Kmid, Kout = Ku + Ks, W * Cmid, W * Cout

    # Fold BN (eval) scale into conv weights: conv(x, w) * s == conv(x, w * s).
    w1f = w1 * s1
    w2f = w2 * s2
    # Banded weights; up/skip parts of conv1 concatenated along K (fuses the
    # channel concat into a single K=128 matmul per kh tap).  bf16 for the MXU.
    w1b = jnp.concatenate(
        [make_banded_weights(w1f[:, :, :Cprev, :], W),
         make_banded_weights(w1f[:, :, Cprev:, :], W)], axis=1
    ).astype(jnp.bfloat16)                                     # (3, Kin, Kmid)
    w2b = make_banded_weights(w2f, W).astype(jnp.bfloat16)     # (3, Kmid, Kout)
    bias1 = jnp.tile(b1, W).reshape(1, Kmid).astype(jnp.float32)  # lane-dense
    bias2 = jnp.tile(b2, W).reshape(1, Kout).astype(jnp.float32)

    # Lane-dense rows: channels fold into the lane axis (free row-major
    # reshape).  bf16 inputs halve the HBM->VMEM input DMA.
    up2 = up_nhwc.reshape(N, H, Ku).astype(jnp.bfloat16)
    sk2 = skip_nhwc.reshape(N, H, Ks).astype(jnp.bfloat16)

    def kernel(up_ref, sk_ref, w1_ref, b1_ref, w2_ref, b2_ref, o_ref,
               x_pad, mid_pad):
        # Zero ONLY the two halo rows (interior rows are fully overwritten
        # below).  Done every step: VMEM scratch persists across grid steps,
        # and with a "parallel" axis different TensorCores own different steps.
        zin = jnp.zeros((1, Kin), x_pad.dtype)
        zmid = jnp.zeros((1, Kmid), mid_pad.dtype)
        x_pad[pl.ds(0, 1), :] = zin
        x_pad[pl.ds(H + 1, 1), :] = zin
        mid_pad[pl.ds(0, 1), :] = zmid
        mid_pad[pl.ds(H + 1, 1), :] = zmid

        # Fused channel concat: up at lane offset 0, skip at lane offset Ku.
        x_pad[pl.ds(1, H), pl.ds(0, Ku)] = up_ref[...].astype(x_pad.dtype)
        x_pad[pl.ds(1, H), pl.ds(Ku, Ks)] = sk_ref[...].astype(x_pad.dtype)

        # --- conv1 + folded BN1 + ReLU: one banded matmul per kh tap --------
        # Operands are contiguous 2-D slices of the per-image scratch (no
        # strided-reshape relayout); bf16 on the MXU, f32 accumulation.
        acc1 = jnp.zeros((H, Kmid), jnp.float32)
        for kh in range(3):
            acc1 += jnp.dot(x_pad[pl.ds(kh, H), :].astype(jnp.bfloat16),
                            w1_ref[kh], preferred_element_type=jnp.float32)
        y1 = jnp.maximum(acc1 + b1_ref[...], 0.0)              # f32 epilogue

        # Intermediate into its padded scratch for the second "same" conv.
        mid_pad[pl.ds(1, H), :] = y1.astype(mid_pad.dtype)

        # --- conv2 + folded BN2 + ReLU --------------------------------------
        acc2 = jnp.zeros((H, Kout), jnp.float32)
        for kh in range(3):
            acc2 += jnp.dot(mid_pad[pl.ds(kh, H), :].astype(jnp.bfloat16),
                            w2_ref[kh], preferred_element_type=jnp.float32)
        y2 = jnp.maximum(acc2 + b2_ref[...], 0.0)

        # Lane-dense output store: last dim W*Cout (=128 at demo sizes).
        o_ref[...] = y2.astype(o_ref.dtype)

    out = pl.pallas_call(
        kernel,
        out_shape=jax.ShapeDtypeStruct((N, H, Kout), jnp.float32),
        grid_spec=pltpu.PrefetchScalarGridSpec(
            num_scalar_prefetch=0,
            grid=(N,),   # one image per step: DMA/compute overlap, M = H rows
            in_specs=[
                pl.BlockSpec((None, H, Ku), lambda n: (n, 0, 0)),
                pl.BlockSpec((None, H, Ks), lambda n: (n, 0, 0)),
                # Weights / biases: constant index_maps -> stay VMEM-resident.
                pl.BlockSpec((3, Kin, Kmid), lambda n: (0, 0, 0)),
                pl.BlockSpec((1, Kmid), lambda n: (0, 0)),
                pl.BlockSpec((3, Kmid, Kout), lambda n: (0, 0, 0)),
                pl.BlockSpec((1, Kout), lambda n: (0, 0)),
            ],
            out_specs=pl.BlockSpec((None, H, Kout), lambda n: (n, 0, 0)),
            scratch_shapes=[
                pltpu.VMEM((H + 2, Kin), jnp.float32),   # padded concat input
                pltpu.VMEM((H + 2, Kmid), jnp.float32),  # padded mid activ.
            ],
        ),
        compiler_params=pltpu.CompilerParams(
            # Batch axis is embarrassingly parallel -> shards across v7x's two
            # TensorCores; no effect (and no cost) on single-TC v5e/v6e.
            dimension_semantics=("parallel",)),
    )(up2, sk2, w1b, bias1, w2b, bias2)

    return out.reshape(N, H, W, Cout)


# ----------------------------------------------------------------------------
# JAX glue: bilinear upsample (align_corners=True), NCHW<->NHWC
# ----------------------------------------------------------------------------
def bilinear_resize_ac(x, out_h, out_w):
    """Bilinear resize with align_corners=True.  x: (N, H, W, C)."""
    N, H, W, C = x.shape

    def src_coords(out_size, in_size):
        if out_size == 1:
            return jnp.zeros((out_size,), jnp.float32)
        return jnp.arange(out_size, dtype=jnp.float32) * (
            (in_size - 1) / (out_size - 1))

    ys = src_coords(out_h, H)
    xs = src_coords(out_w, W)
    y0 = jnp.clip(jnp.floor(ys).astype(jnp.int32), 0, H - 1)
    y1 = jnp.clip(y0 + 1, 0, H - 1)
    wy = (ys - y0.astype(jnp.float32))[None, :, None, None]
    x0 = jnp.clip(jnp.floor(xs).astype(jnp.int32), 0, W - 1)
    x1 = jnp.clip(x0 + 1, 0, W - 1)
    wx = (xs - x0.astype(jnp.float32))[None, None, :, None]

    def gather(yi, xi):
        return x[:, yi][:, :, xi]                            # (N, oh, ow, C)

    top = gather(y0, x0) * (1.0 - wx) + gather(y0, x1) * wx
    bot = gather(y1, x0) * (1.0 - wx) + gather(y1, x1) * wx
    return top * (1.0 - wy) + bot * wy


@jax.jit
def nested_up_block_forward(prev_nchw, skip_nchw_list, w1, s1, b1, w2, s2, b2):
    """NestedUpBlock.forward.  Inputs/outputs NCHW; skips as a list."""
    prev = jnp.transpose(prev_nchw, (0, 2, 3, 1))            # NCHW -> NHWC
    skips = [jnp.transpose(s, (0, 2, 3, 1)) for s in skip_nchw_list]

    up = bilinear_resize_ac(prev, 2 * prev.shape[1], 2 * prev.shape[2])
    for s in skips:
        if up.shape[1:3] != s.shape[1:3]:
            up = bilinear_resize_ac(up, s.shape[1], s.shape[2])

    skip = skips[0] if len(skips) == 1 else jnp.concatenate(skips, axis=-1)
    # The concat of `up` with the skips is fused into the Pallas kernel
    # (conv1 banded weights concatenated along K) -> never materialized in HBM.
    out = double_conv_pallas(up, skip, w1, s1, b1, w2, s2, b2)
    return jnp.transpose(out, (0, 3, 1, 2))                  # NHWC -> NCHW


# ----------------------------------------------------------------------------
# Pure-JAX reference matching the kernel numerics (bf16 MXU operands,
# folded-BN weights, f32 accumulation) for verification of the Pallas path.
# ----------------------------------------------------------------------------
def double_conv_ref(x_nhwc, w1, s1, b1, w2, s2, b2):
    def conv(x, w):
        return jax.lax.conv_general_dilated(
            x.astype(jnp.bfloat16), w.astype(jnp.bfloat16),
            window_strides=(1, 1), padding="SAME",
            dimension_numbers=("NHWC", "HWIO", "NHWC"),
            preferred_element_type=jnp.float32)
    y = jnp.maximum(conv(x_nhwc, w1 * s1) + b1, 0.0)
    y = jnp.maximum(conv(y, w2 * s2) + b2, 0.0)
    return y


# ----------------------------------------------------------------------------
# Main
# ----------------------------------------------------------------------------
if __name__ == "__main__":
    key = jax.random.PRNGKey(0)
    keys = jax.random.split(key, 12)

    prev_channels, skip_channels, out_channels = 4, 4, 8
    total_in = prev_channels + skip_channels
    eps = 1e-5

    # DoubleConv parameters (deterministic init).  Conv weights kept in HWIO.
    w1 = jax.random.normal(keys[0], (3, 3, total_in, out_channels), jnp.float32) * 0.1
    g1 = 1.0 + 0.1 * jax.random.normal(keys[1], (out_channels,), jnp.float32)
    be1 = 0.1 * jax.random.normal(keys[2], (out_channels,), jnp.float32)
    rm1 = 0.1 * jax.random.normal(keys[3], (out_channels,), jnp.float32)
    rv1 = jax.random.uniform(keys[4], (out_channels,), jnp.float32, 0.5, 1.5)
    s1 = g1 / jnp.sqrt(rv1 + eps)
    b1 = be1 - rm1 * s1

    w2 = jax.random.normal(keys[5], (3, 3, out_channels, out_channels), jnp.float32) * 0.1
    g2 = 1.0 + 0.1 * jax.random.normal(keys[6], (out_channels,), jnp.float32)
    be2 = 0.1 * jax.random.normal(keys[7], (out_channels,), jnp.float32)
    rm2 = 0.1 * jax.random.normal(keys[8], (out_channels,), jnp.float32)
    rv2 = jax.random.uniform(keys[9], (out_channels,), jnp.float32, 0.5, 1.5)
    s2 = g2 / jnp.sqrt(rv2 + eps)
    b2 = be2 - rm2 * s2

    # Inputs (NCHW like PyTorch): prev feature at half resolution, one skip.
    prev_feature = jax.random.normal(keys[10], (2, prev_channels, 8, 8), jnp.float32)
    skip_feature = jax.random.normal(keys[11], (2, skip_channels, 16, 16), jnp.float32)

    out = nested_up_block_forward(prev_feature, [skip_feature],
                                  w1, s1, b1, w2, s2, b2)
    out = jax.block_until_ready(out)
    assert out.shape == (2, out_channels, 16, 16), out.shape

    # Verify the Pallas DoubleConv against a pure-JAX reference on the same
    # concatenated input (both paths use bf16 operands + f32 accumulation).
    prev_nhwc = jnp.transpose(prev_feature, (0, 2, 3, 1))
    skip_nhwc = jnp.transpose(skip_feature, (0, 2, 3, 1))
    up = bilinear_resize_ac(prev_nhwc, 16, 16)
    concat = jnp.concatenate([up, skip_nhwc], axis=-1)
    ref = double_conv_ref(concat, w1, s1, b1, w2, s2, b2)
    ref_nchw = jnp.transpose(ref, (0, 3, 1, 2))
    assert jnp.allclose(out, ref_nchw, rtol=5e-3, atol=5e-3), (
        float(jnp.max(jnp.abs(out - ref_nchw))))

    print("KERNEL_OK")
</pallas_src>

<mosaic_0001>
module attributes {stable_mosaic.version = 11 : i64} {
  func.func @kernel(%arg0: i32, %arg1: memref<1x16x64xbf16, #tpu.memory_space<vmem>>, %arg2: memref<1x16x64xbf16, #tpu.memory_space<vmem>>, %arg3: memref<3x128x128xbf16, #tpu.memory_space<vmem>>, %arg4: memref<1x128xf32, #tpu.memory_space<vmem>>, %arg5: memref<3x128x128xbf16, #tpu.memory_space<vmem>>, %arg6: memref<1x128xf32, #tpu.memory_space<vmem>>, %arg7: memref<1x16x128xf32, #tpu.memory_space<vmem>>, %arg8: memref<18x128xf32, #tpu.memory_space<vmem>>, %arg9: memref<18x128xf32, #tpu.memory_space<vmem>>) attributes {dimension_semantics = [#tpu.dimension_semantics<parallel>], iteration_bounds = array<i64: 2>, scalar_prefetch = 0 : i64, scratch_operands = 2 : i64, tpu.core_type = #tpu.core_type<tc>, window_params = [{transform_indices = @transform_0, window_bounds = array<i64: 1, 16, 64>}, {transform_indices = @transform_1, window_bounds = array<i64: 1, 16, 64>}, {pipeline_mode = #tpu.pipeline_mode<synchronous>, transform_indices = @transform_2, window_bounds = array<i64: 3, 128, 128>}, {pipeline_mode = #tpu.pipeline_mode<synchronous>, transform_indices = @transform_3, window_bounds = array<i64: 1, 128>}, {pipeline_mode = #tpu.pipeline_mode<synchronous>, transform_indices = @transform_4, window_bounds = array<i64: 3, 128, 128>}, {pipeline_mode = #tpu.pipeline_mode<synchronous>, transform_indices = @transform_5, window_bounds = array<i64: 1, 128>}, {transform_indices = @transform_6, window_bounds = array<i64: 1, 16, 128>}]} {
    %cst = arith.constant 0.000000e+00 : f32
    %0 = vector.broadcast %cst : f32 to vector<1x128xf32>
    %cst_0 = arith.constant 0.000000e+00 : f32
    %1 = vector.broadcast %cst_0 : f32 to vector<1x128xf32>
    %c0 = arith.constant 0 : index
    %c0_1 = arith.constant 0 : index
    %2 = vector.load %arg8[%c0, %c0_1] : memref<18x128xf32, #tpu.memory_space<vmem>>, vector<1x128xf32>
    tpu.vector_store %arg8[%c0, %c0_1], %0 {strides = array<i32>} : memref<18x128xf32, #tpu.memory_space<vmem>>, vector<1x128xf32>,
    %c17 = arith.constant 17 : index
    %c0_2 = arith.constant 0 : index
    %3 = vector.load %arg8[%c17, %c0_2] : memref<18x128xf32, #tpu.memory_space<vmem>>, vector<1x128xf32>
    tpu.vector_store %arg8[%c17, %c0_2], %0 {strides = array<i32>} : memref<18x128xf32, #tpu.memory_space<vmem>>, vector<1x128xf32>,
    %c0_3 = arith.constant 0 : index
    %c0_4 = arith.constant 0 : index
    %4 = vector.load %arg9[%c0_3, %c0_4] : memref<18x128xf32, #tpu.memory_space<vmem>>, vector<1x128xf32>
    tpu.vector_store %arg9[%c0_3, %c0_4], %1 {strides = array<i32>} : memref<18x128xf32, #tpu.memory_space<vmem>>, vector<1x128xf32>,
    %c17_5 = arith.constant 17 : index
    %c0_6 = arith.constant 0 : index
    %5 = vector.load %arg9[%c17_5, %c0_6] : memref<18x128xf32, #tpu.memory_space<vmem>>, vector<1x128xf32>
    tpu.vector_store %arg9[%c17_5, %c0_6], %1 {strides = array<i32>} : memref<18x128xf32, #tpu.memory_space<vmem>>, vector<1x128xf32>,
    %c0_7 = arith.constant 0 : index
    %c0_8 = arith.constant 0 : index
    %c0_9 = arith.constant 0 : index
    %6 = vector.load %arg1[%c0_7, %c0_8, %c0_9] : memref<1x16x64xbf16, #tpu.memory_space<vmem>>, vector<1x16x64xbf16>
    %7 = vector.shape_cast %6 : vector<1x16x64xbf16> to vector<16x64xbf16>
    %8 = arith.extf %7 : vector<16x64xbf16> to vector<16x64xf32>
    %c1 = arith.constant 1 : index
    %c0_10 = arith.constant 0 : index
    %9 = vector.load %arg8[%c1, %c0_10] : memref<18x128xf32, #tpu.memory_space<vmem>>, vector<16x64xf32>
    tpu.vector_store %arg8[%c1, %c0_10], %8 {strides = array<i32>} : memref<18x128xf32, #tpu.memory_space<vmem>>, vector<16x64xf32>,
    %c0_11 = arith.constant 0 : index
    %c0_12 = arith.constant 0 : index
    %c0_13 = arith.constant 0 : index
    %10 = vector.load %arg2[%c0_11, %c0_12, %c0_13] : memref<1x16x64xbf16, #tpu.memory_space<vmem>>, vector<1x16x64xbf16>
    %11 = vector.shape_cast %10 : vector<1x16x64xbf16> to vector<16x64xbf16>
    %12 = arith.extf %11 : vector<16x64xbf16> to vector<16x64xf32>
    %c1_14 = arith.constant 1 : index
    %c64 = arith.constant 64 : index
    %13 = vector.load %arg8[%c1_14, %c64] : memref<18x128xf32, #tpu.memory_space<vmem>>, vector<16x64xf32>
    tpu.vector_store %arg8[%c1_14, %c64], %12 {strides = array<i32>} : memref<18x128xf32, #tpu.memory_space<vmem>>, vector<16x64xf32>,
    %cst_15 = arith.constant 0.000000e+00 : f32
    %14 = vector.broadcast %cst_15 : f32 to vector<16x128xf32>
    %c0_16 = arith.constant 0 : index
    %c0_17 = arith.constant 0 : index
    %15 = vector.load %arg8[%c0_16, %c0_17] : memref<18x128xf32, #tpu.memory_space<vmem>>, vector<16x128xf32>
    %16 = arith.truncf %15 : vector<16x128xf32> to vector<16x128xbf16>
    %c0_18 = arith.constant 0 : index
    %c0_19 = arith.constant 0 : index
    %c0_20 = arith.constant 0 : index
    %17 = vector.load %arg3[%c0_18, %c0_19, %c0_20] : memref<3x128x128xbf16, #tpu.memory_space<vmem>>, vector<1x128x128xbf16>
    %18 = vector.shape_cast %17 : vector<1x128x128xbf16> to vector<128x128xbf16>
    %cst_21 = arith.constant dense<0.000000e+00> : vector<16x128xf32>
    %19 = tpu.matmul %16, %18, %cst_21 {dimension_numbers = #tpu.dot_dimension_numbers<[1], [0], [0], [1], [0, 0, 1, 1], [], []>} : vector<16x128xbf16>, vector<128x128xbf16>, vector<16x128xf32> -> vector<16x128xf32>
    %20 = arith.addf %14, %19 : vector<16x128xf32>
    %c1_22 = arith.constant 1 : index
    %c0_23 = arith.constant 0 : index
    %21 = vector.load %arg8[%c1_22, %c0_23] : memref<18x128xf32, #tpu.memory_space<vmem>>, vector<16x128xf32>
    %22 = arith.truncf %21 : vector<16x128xf32> to vector<16x128xbf16>
    %c1_24 = arith.constant 1 : index
    %c0_25 = arith.constant 0 : index
    %c0_26 = arith.constant 0 : index
    %23 = vector.load %arg3[%c1_24, %c0_25, %c0_26] : memref<3x128x128xbf16, #tpu.memory_space<vmem>>, vector<1x128x128xbf16>
    %24 = vector.shape_cast %23 : vector<1x128x128xbf16> to vector<128x128xbf16>
    %cst_27 = arith.constant dense<0.000000e+00> : vector<16x128xf32>
    %25 = tpu.matmul %22, %24, %cst_27 {dimension_numbers = #tpu.dot_dimension_numbers<[1], [0], [0], [1], [0, 0, 1, 1], [], []>} : vector<16x128xbf16>, vector<128x128xbf16>, vector<16x128xf32> -> vector<16x128xf32>
    %26 = arith.addf %20, %25 : vector<16x128xf32>
    %c2 = arith.constant 2 : index
    %c0_28 = arith.constant 0 : index
    %27 = vector.load %arg8[%c2, %c0_28] : memref<18x128xf32, #tpu.memory_space<vmem>>, vector<16x128xf32>
    %28 = arith.truncf %27 : vector<16x128xf32> to vector<16x128xbf16>
    %c2_29 = arith.constant 2 : index
    %c0_30 = arith.constant 0 : index
    %c0_31 = arith.constant 0 : index
    %29 = vector.load %arg3[%c2_29, %c0_30, %c0_31] : memref<3x128x128xbf16, #tpu.memory_space<vmem>>, vector<1x128x128xbf16>
    %30 = vector.shape_cast %29 : vector<1x128x128xbf16> to vector<128x128xbf16>
    %cst_32 = arith.constant dense<0.000000e+00> : vector<16x128xf32>
    %31 = tpu.matmul %28, %30, %cst_32 {dimension_numbers = #tpu.dot_dimension_numbers<[1], [0], [0], [1], [0, 0, 1, 1], [], []>} : vector<16x128xbf16>, vector<128x128xbf16>, vector<16x128xf32> -> vector<16x128xf32>
    %32 = arith.addf %26, %31 : vector<16x128xf32>
    %c0_33 = arith.constant 0 : index
    %c0_34 = arith.constant 0 : index
    %33 = vector.load %arg4[%c0_33, %c0_34] : memref<1x128xf32, #tpu.memory_space<vmem>>, vector<1x128xf32>
    %34 = vector.broadcast %33 : vector<1x128xf32> to vector<16x128xf32>
    %35 = arith.addf %32, %34 : vector<16x128xf32>
    %cst_35 = arith.constant 0.000000e+00 : f32
    %36 = vector.broadcast %cst_35 : f32 to vector<16x128xf32>
    %37 = arith.maximumf %35, %36 : vector<16x128xf32>
    %c1_36 = arith.constant 1 : index
    %c0_37 = arith.constant 0 : index
    %38 = vector.load %arg9[%c1_36, %c0_37] : memref<18x128xf32, #tpu.memory_space<vmem>>, vector<16x128xf32>
    tpu.vector_store %arg9[%c1_36, %c0_37], %37 {strides = array<i32>} : memref<18x128xf32, #tpu.memory_space<vmem>>, vector<16x128xf32>,
    %cst_38 = arith.constant 0.000000e+00 : f32
    %39 = vector.broadcast %cst_38 : f32 to vector<16x128xf32>
    %c0_39 = arith.constant 0 : index
    %c0_40 = arith.constant 0 : index
    %40 = vector.load %arg9[%c0_39, %c0_40] : memref<18x128xf32, #tpu.memory_space<vmem>>, vector<16x128xf32>
    %41 = arith.truncf %40 : vector<16x128xf32> to vector<16x128xbf16>
    %c0_41 = arith.constant 0 : index
    %c0_42 = arith.constant 0 : index
    %c0_43 = arith.constant 0 : index
    %42 = vector.load %arg5[%c0_41, %c0_42, %c0_43] : memref<3x128x128xbf16, #tpu.memory_space<vmem>>, vector<1x128x128xbf16>
    %43 = vector.shape_cast %42 : vector<1x128x128xbf16> to vector<128x128xbf16>
    %cst_44 = arith.constant dense<0.000000e+00> : vector<16x128xf32>
    %44 = tpu.matmul %41, %43, %cst_44 {dimension_numbers = #tpu.dot_dimension_numbers<[1], [0], [0], [1], [0, 0, 1, 1], [], []>} : vector<16x128xbf16>, vector<128x128xbf16>, vector<16x128xf32> -> vector<16x128xf32>
    %45 = arith.addf %39, %44 : vector<16x128xf32>
    %c1_45 = arith.constant 1 : index
    %c0_46 = arith.constant 0 : index
    %46 = vector.load %arg9[%c1_45, %c0_46] : memref<18x128xf32, #tpu.memory_space<vmem>>, vector<16x128xf32>
    %47 = arith.truncf %46 : vector<16x128xf32> to vector<16x128xbf16>
    %c1_47 = arith.constant 1 : index
    %c0_48 = arith.constant 0 : index
    %c0_49 = arith.constant 0 : index
    %48 = vector.load %arg5[%c1_47, %c0_48, %c0_49] : memref<3x128x128xbf16, #tpu.memory_space<vmem>>, vector<1x128x128xbf16>
    %49 = vector.shape_cast %48 : vector<1x128x128xbf16> to vector<128x128xbf16>
    %cst_50 = arith.constant dense<0.000000e+00> : vector<16x128xf32>
    %50 = tpu.matmul %47, %49, %cst_50 {dimension_numbers = #tpu.dot_dimension_numbers<[1], [0], [0], [1], [0, 0, 1, 1], [], []>} : vector<16x128xbf16>, vector<128x128xbf16>, vector<16x128xf32> -> vector<16x128xf32>
    %51 = arith.addf %45, %50 : vector<16x128xf32>
    %c2_51 = arith.constant 2 : index
    %c0_52 = arith.constant 0 : index
    %52 = vector.load %arg9[%c2_51, %c0_52] : memref<18x128xf32, #tpu.memory_space<vmem>>, vector<16x128xf32>
    %53 = arith.truncf %52 : vector<16x128xf32> to vector<16x128xbf16>
    %c2_53 = arith.constant 2 : index
    %c0_54 = arith.constant 0 : index
    %c0_55 = arith.constant 0 : index
    %54 = vector.load %arg5[%c2_53, %c0_54, %c0_55] : memref<3x128x128xbf16, #tpu.memory_space<vmem>>, vector<1x128x128xbf16>
    %55 = vector.shape_cast %54 : vector<1x128x128xbf16> to vector<128x128xbf16>
    %cst_56 = arith.constant dense<0.000000e+00> : vector<16x128xf32>
    %56 = tpu.matmul %53, %55, %cst_56 {dimension_numbers = #tpu.dot_dimension_numbers<[1], [0], [0], [1], [0, 0, 1, 1], [], []>} : vector<16x128xbf16>, vector<128x128xbf16>, vector<16x128xf32> -> vector<16x128xf32>
    %57 = arith.addf %51, %56 : vector<16x128xf32>
    %c0_57 = arith.constant 0 : index
    %c0_58 = arith.constant 0 : index
    %58 = vector.load %arg6[%c0_57, %c0_58] : memref<1x128xf32, #tpu.memory_space<vmem>>, vector<1x128xf32>
    %59 = vector.broadcast %58 : vector<1x128xf32> to vector<16x128xf32>
    %60 = arith.addf %57, %59 : vector<16x128xf32>
    %cst_59 = arith.constant 0.000000e+00 : f32
    %61 = vector.broadcast %cst_59 : f32 to vector<16x128xf32>
    %62 = arith.maximumf %60, %61 : vector<16x128xf32>
    %c0_60 = arith.constant 0 : index
    %c0_61 = arith.constant 0 : index
    %c0_62 = arith.constant 0 : index
    %63 = vector.load %arg7[%c0_60, %c0_61, %c0_62] : memref<1x16x128xf32, #tpu.memory_space<vmem>>, vector<1x16x128xf32>
    %64 = vector.shape_cast %63 : vector<1x16x128xf32> to vector<16x128xf32>
    %65 = vector.shape_cast %62 : vector<16x128xf32> to vector<1x16x128xf32>
    tpu.vector_store %arg7[%c0_60, %c0_61, %c0_62], %65 {strides = array<i32>} : memref<1x16x128xf32, #tpu.memory_space<vmem>>, vector<1x16x128xf32>,
    return
  }
  func.func @transform_0(%arg0: i32) -> (i32, i32, i32) {
    %c0_i32 = arith.constant 0 : i32
    %c0_i32_0 = arith.constant 0 : i32
    %c0_i32_1 = arith.constant 0 : i32
    return %arg0, %c0_i32, %c0_i32_0 : i32, i32, i32
  }
  func.func @transform_1(%arg0: i32) -> (i32, i32, i32) {
    %c0_i32 = arith.constant 0 : i32
    %c0_i32_0 = arith.constant 0 : i32
    %c0_i32_1 = arith.constant 0 : i32
    return %arg0, %c0_i32, %c0_i32_0 : i32, i32, i32
  }
  func.func @transform_2(%arg0: i32) -> (i32, i32, i32) {
    %c0_i32 = arith.constant 0 : i32
    %c0_i32_0 = arith.constant 0 : i32
    %c0_i32_1 = arith.constant 0 : i32
    %c0_i32_2 = arith.constant 0 : i32
    return %c0_i32, %c0_i32_0, %c0_i32_1 : i32, i32, i32
  }
  func.func @transform_3(%arg0: i32) -> (i32, i32) {
    %c0_i32 = arith.constant 0 : i32
    %c0_i32_0 = arith.constant 0 : i32
    %c0_i32_1 = arith.constant 0 : i32
    return %c0_i32, %c0_i32_0 : i32, i32
  }
  func.func @transform_4(%arg0: i32) -> (i32, i32, i32) {
    %c0_i32 = arith.constant 0 : i32
    %c0_i32_0 = arith.constant 0 : i32
    %c0_i32_1 = arith.constant 0 : i32
    %c0_i32_2 = arith.constant 0 : i32
    return %c0_i32, %c0_i32_0, %c0_i32_1 : i32, i32, i32
  }
  func.func @transform_5(%arg0: i32) -> (i32, i32) {
    %c0_i32 = arith.constant 0 : i32
    %c0_i32_0 = arith.constant 0 : i32
    %c0_i32_1 = arith.constant 0 : i32
    return %c0_i32, %c0_i32_0 : i32, i32
  }
  func.func @transform_6(%arg0: i32) -> (i32, i32, i32) {
    %c0_i32 = arith.constant 0 : i32
    %c0_i32_0 = arith.constant 0 : i32
    %c0_i32_1 = arith.constant 0 : i32
    return %arg0, %c0_i32, %c0_i32_0 : i32, i32, i32
  }
}

</mosaic_0001>

<bundles_post_ra>
// kernel: tile.13
= control target key start
LH: loop header
LB: loop body
LE: loop exit
PB: predicated region body
PF: predicated region fallthrough
CT: control target
= control target key end

     0   :  { %2 = vsyncpa [#allocation1], 0  ;;  %s51_s8 = smov [#allocation0]   ;;  %s71_s0 = inlined_call_operand.hbm [shape: f32[8], index: 0, kind: input, shape index: {}]   ;;  %s72_s1 = inlined_call_operand.vmem [shape: f32[16,8], index: 1, kind: output, shape index: {}]  }
   0x1   :  { %s8_s0 = sshll.u32 %s71_s0, 4  ;;  %s10_s9 = sshll.u32 %s51_s8, 4  ;;  %s9_s0 = int_to_ptr.hbm [resolvable:$true] %s8_s0  ;;  %s11_s9 = int_to_ptr.vmem [resolvable:$true] %s10_s9 }
   0x2   :  { %13 = dma.hbm_to_vmem [thread:$0]  %s9_s0, 16, %s11_s9, [#allocation1]  }
   0x3   :  { %49 = dma.done.wait [#allocation1], 16  }
   0x4   :  { %50 = vsyncadd [#allocation1], 4294967280  ;;  %v18_v0 = vld [vmem:[#allocation0] ss:$0 sm:$0xff] }
   0x5   :  { %19 = vst [vmem:[%s72_s1] sm:$0xff] %v18_v0 }
   0x6   :  { %23 = vst [vmem:[%s72_s1 + $0x8] sm:$0xff] %v18_v0 }
   0x7   :  { %22 = vsyncpa [#allocation1], 1 }

// kernel: tile.14
= control target key start
LH: loop header
LB: loop body
LE: loop exit
PB: predicated region body
PF: predicated region fallthrough
CT: control target
= control target key end

     0   :  { %s131_s10 = smov 120   ;;  %s132_s11 = smov 104   ;;  %vm3_vm0 = vcmask 64512   ;;  %vm9_vm1 = vcmask 1048512   ;;  %vm15_vm2 = vcmask 982912   ;;  %vm21_vm3 = vcmask 917312   ;;  %s207_s0 = inlined_call_operand.vmem [shape: f32[16,8], index: 0, kind: input, shape index: {}]   ;;  %s208_s1 = inlined_call_operand.vmem [shape: f32[1,128], index: 1, kind: output, shape index: {}]  }
   0x1   :  { %v101_v0 = vld [vmem:[%s207_s0 + $0xf] sm:$0x1]   ;;  %v103_v1 = vld [vmem:[%s207_s0 + $0xd] sm:$0x1]   ;;  %v105_v2 = vld [vmem:[%s207_s0 + $0xb] sm:$0x1]  }
   0x2   :  { %7 = vrot.lane.b32.xlu0 %v101_v0, %s131_s10  ;;  %19 = vrot.lane.b32.xlu1 %v103_v1, %s132_s11  ;;  %s133_s14 = smov 88   ;;  %v102_v3 = vld [vmem:[%s207_s0 + $0xe] sm:$0x1]   ;;  %v104_v4 = vld [vmem:[%s207_s0 + $0xc] sm:$0x1]   ;;  %s134_s19 = smov 112  }
   0x3   :  { %31 = vrot.lane.b32.xlu2 %v105_v2, %s133_s14  ;;  %s135_s20 = smov 96   ;;  %v106_v5 = vld [vmem:[%s207_s0 + $0xa] sm:$0x1]   ;;  %s136_s23 = smov 80   ;;  %v107_v6 = vld [vmem:[%s207_s0 + $0x9] sm:$0x1]  }
   0x4   :  { %v108_v7 = vld [vmem:[%s207_s0 + $0x8] sm:$0x1]   ;;  %s137_s28 = smov 72   ;;  %s138_s29 = smov 64   ;;  %v109_v8 = vld [vmem:[%s207_s0 + $0x7] sm:$0x1]  }
   0x5   :  { %s139_s3 = smov 56   ;;  %v110_v9 = vld [vmem:[%s207_s0 + $0x6] sm:$0x1]   ;;  %v111_v10 = vld [vmem:[%s207_s0 + $0x5] sm:$0x1]   ;;  %s140_s8 = smov 48  }
   0x6   :  { %s141_s9 = smov 40   ;;  %v112_v11 = vld [vmem:[%s207_s0 + $0x4] sm:$0x1]   ;;  %s142_s12 = smov 32   ;;  %v113_v12 = vld [vmem:[%s207_s0 + $0x3] sm:$0x1]  }
   0x7   :  { %v114_v13 = vld [vmem:[%s207_s0 + $0x2] sm:$0x1]   ;;  %s143_s17 = smov 24   ;;  %s144_s18 = smov 16   ;;  %v115_v14 = vld [vmem:[%s207_s0 + $0x1] sm:$0x1]  }
   0x8   :  { %s145_s21 = smov 8   ;;  %v2_v15 = vld [vmem:[%s207_s0] sm:$0x1]   ;;  %vm27_vm4 = vcmask 851712   ;;  %vm33_vm5 = vcmask 786112   ;;  %vm39_vm6 = vcmask 720512  }
   0x9   :  { %4 = vst.msk [vmem:[#allocation0] sm:$0x1] %vm3_vm0, %v2_v15   ;;  %vm45_vm7 = vcmask 654912   ;;  %vm51_vm8 = vcmask 589312   ;;  %vm57_vm9 = vcmask 523712   ;;  %vm63_vm10 = vcmask 458112  }
   0xa   :  { %13 = vrot.lane.b32.xlu0 %v102_v3, %s134_s19  ;;  %25 = vrot.lane.b32.xlu1 %v104_v4, %s135_s20  ;;  %vm69_vm11 = vcmask 392512   ;;  %vm75_vm12 = vcmask 326912   ;;  %vm81_vm13 = vcmask 261312   ;;  %vm87_vm14 = vcmask 195712  }
   0xb   :  { %37 = vrot.lane.b32.xlu2 %v106_v5, %s136_s23  ;;  %vm93_vm15 = vcmask 130112  }
  0x12   :  { %43 = vrot.lane.b32.xlu0 %v107_v6, %s137_s28  ;;  %49 = vrot.lane.b32.xlu1 %v108_v7, %s138_s29 }
  0x13   :  { %55 = vrot.lane.b32.xlu2 %v109_v8, %s139_s3 }
  0x1a   :  { %61 = vrot.lane.b32.xlu0 %v110_v9, %s140_s8  ;;  %67 = vrot.lane.b32.xlu1 %v111_v10, %s141_s9 }
  0x1b   :  { %73 = vrot.lane.b32.xlu2 %v112_v11, %s142_s12 }
  0x22   :  { %79 = vrot.lane.b32.xlu0 %v113_v12, %s143_s17  ;;  %85 = vrot.lane.b32.xlu1 %v114_v13, %s144_s18 }
  0x23   :  { %91 = vrot.lane.b32.xlu2 %v115_v14, %s145_s21 }
  0x5d   :  { %v32_v16 = vpop.permute.xlu2 %31  }
  0x65   :  { %v38_v17 = vpop.permute.xlu2 %37  }
  0x6d   :  { %v56_v18 = vpop.permute.xlu2 %55  }
  0x74   :  { %v8_v19 = vpop.permute.xlu0 %7   ;;  %v20_v20 = vpop.permute.xlu1 %19  }
  0x75   :  { %10 = vst.msk [vmem:[#allocation0] sm:$0x1] %vm9_vm1, %v8_v19   ;;  %v74_v21 = vpop.permute.xlu2 %73  }
  0x7c   :  { %v14_v22 = vpop.permute.xlu0 %13   ;;  %v26_v23 = vpop.permute.xlu1 %25  }
  0x7d   :  { %16 = vst.msk [vmem:[#allocation0] sm:$0x1] %vm15_vm2, %v14_v22   ;;  %v92_v24 = vpop.permute.xlu2 %91  }
  0x7e   :  { %22 = vst.msk [vmem:[#allocation0] sm:$0x1] %vm21_vm3, %v20_v20  }
  0x7f   :  { %28 = vst.msk [vmem:[#allocation0] sm:$0x1] %vm27_vm4, %v26_v23  }
  0x80   :  { %34 = vst.msk [vmem:[#allocation0] sm:$0x1] %vm33_vm5, %v32_v16  }
  0x81   :  { %40 = vst.msk [vmem:[#allocation0] sm:$0x1] %vm39_vm6, %v38_v17  }
  0x84   :  { %v44_v25 = vpop.permute.xlu0 %43   ;;  %v50_v26 = vpop.permute.xlu1 %49  }
  0x85   :  { %46 = vst.msk [vmem:[#allocation0] sm:$0x1] %vm45_vm7, %v44_v25  }
  0x86   :  { %52 = vst.msk [vmem:[#allocation0] sm:$0x1] %vm51_vm8, %v50_v26  }
  0x87   :  { %58 = vst.msk [vmem:[#allocation0] sm:$0x1] %vm57_vm9, %v56_v18  }
  0x8c   :  { %v62_v27 = vpop.permute.xlu0 %61   ;;  %v68_v28 = vpop.permute.xlu1 %67  }
  0x8d   :  { %64 = vst.msk [vmem:[#allocation0] sm:$0x1] %vm63_vm10, %v62_v27  }
  0x8e   :  { %70 = vst.msk [vmem:[#allocation0] sm:$0x1] %vm69_vm11, %v68_v28  }
  0x8f   :  { %76 = vst.msk [vmem:[#allocation0] sm:$0x1] %vm75_vm12, %v74_v21  }
  0x94   :  { %v80_v29 = vpop.permute.xlu0 %79   ;;  %v86_v30 = vpop.permute.xlu1 %85  }
  0x95   :  { %82 = vst.msk [vmem:[#allocation0] sm:$0x1] %vm81_vm13, %v80_v29  }
  0x96   :  { %88 = vst.msk [vmem:[#allocation0] sm:$0x1] %vm87_vm14, %v86_v30  }
  0x97   :  { %94 = vst.msk [vmem:[#allocation0] sm:$0x1] %vm93_vm15, %v92_v24  }
  0x9e   :  { %v97_v31 = vld [vmem:[#allocation0] sm:$0x1] }
  0x9f   :  { %100 = vst [vmem:[%s208_s1] sm:$0x1] %v97_v31 }

// kernel: nested_up_block_forward.1
= control target key start
LH: loop header
LB: loop body
LE: loop exit
PB: predicated region body
PF: predicated region fallthrough
CT: control target
= control target key end

     0   :  { %s1269_s21 = smov 0   ;;  %s1443_s0 = inlined_call_operand.vmem [shape: bf16[2,16,64], index: 0, kind: input, shape index: {}]   ;;  %s1444_s1 = inlined_call_operand.vmem [shape: bf16[2,16,64], index: 1, kind: input, shape index: {}]   ;;  %s1445_s2 = inlined_call_operand.vmem [shape: bf16[3,128,128], index: 2, kind: input, shape index: {}]   ;;  %s1446_s3 = inlined_call_operand.vmem [shape: f32[1,128], index: 3, kind: input, shape index: {}]   ;;  %s1447_s4 = inlined_call_operand.vmem [shape: bf16[3,128,128], index: 4, kind: input, shape index: {}]   ;;  %s1448_s5 = inlined_call_operand.vmem [shape: f32[1,128], index: 5, kind: input, shape index: {}]   ;;  %s1449_s6 = inlined_call_operand.vmem [shape: f32[2,16,128], index: 6, kind: output, shape index: {}]  }
   0x1 LB: > { %s879_s22 = sadd.s32 4294967295, %s1230_s21   ;;  %p883_p0 = scmp.ge.s32.totalorder %s1230_s21, 1  ;;  %s1230_s21 = sphi %s1269_s21, %s16_s21  }
   0x2   : > { %p222_p1 = scmp.lt.s32.totalorder %s1230_s21, 3 }
   0x4   : > { %p223_p2 = pnand %p883_p0, %p222_p1 }
   0x5   : > { %p257_p3 = scmp.lt.s32.totalorder (!%p223_p2), %s879_s22, 1  ;;  %s1232_s30 = smov (!%p223_p2), 64  }
   0x6   : > { %226 = sbr.rel (%p223_p2) target bundleno = 448 (0x1c0), region = 44 }
   0xb   : > { %v1166_v0 = vld [vmem:[%s1445_s2 + $0x78] sm:$0xff]  ;;  %s1451_s22 = smov (!%p257_p3, %s879_s22), 1  ;;  %v1165_v3 = vld [vmem:[%s1445_s2 + $0x70] sm:$0xff]  ;;  %v1164_v6 = vld [vmem:[%s1445_s2 + $0x68] sm:$0xff]  ;;  %vm280_vm0 = vcmask 523264   ;;  %v1233_v28 = vmov 0.0  }
   0xc   : > { %v1158_v1 = vld [vmem:[%s1445_s2 + $0x38] sm:$0xff]  ;;  %385 = vmatpush.bf16.msra.mxu0 %v1166_v0  ;;  %v1157_v4 = vld [vmem:[%s1445_s2 + $0x30] sm:$0xff]  ;;  %s1148_s11 = sshll.u32 %s1451_s22, 3  ;;  %v1156_v9 = vld [vmem:[%s1445_s2 + $0x28] sm:$0xff]  ;;  %272 = vst [vmem:[#allocation2] sm:$0x1] %v1233_v28 }
   0xd   : > { %v1174_v2 = vld [vmem:[%s1445_s2 + $0xb8] sm:$0xff]  ;;  %447 = vmatpush.bf16.msra.mxu1 %v1158_v1  ;;  %v1173_v5 = vld [vmem:[%s1445_s2 + $0xb0] sm:$0xff]  ;;  %s266_s14 = scalar_lea.vmem %s1444_s1, %s1148_s11  ;;  %s261_s17 = scalar_lea.vmem %s1443_s0, %s1148_s11  ;;  %v1172_v14 = vld [vmem:[%s1445_s2 + $0xa8] sm:$0xff]  ;;  %273 = vst [vmem:[#allocation2 + $0x11] sm:$0x1] %v1233_v28  ;;  %vm295_vm1 = vcmask 1048064  }
   0xe   : > { %529 = vmatpush.bf16.msra.mxu2 %v1174_v2  ;;  %v1204_v7 = vld [vmem:[%s266_s14] sm:$0xff]   ;;  %v1162_v19 = vld [vmem:[%s1445_s2 + $0x58] sm:$0xff]  ;;  %v1161_v22 = vld [vmem:[%s1445_s2 + $0x50] sm:$0xff]  ;;  %274 = vst [vmem:[#allocation3] sm:$0x1] %v1233_v28  ;;  %s1150_s19 = sshll.u32 %s1451_s22, 4 }
   0xf   : > { %v1200_v8 = vld [vmem:[%s261_s17] sm:$0xff]   ;;  %v1205_v10 = vunpack.c.l.bf16 %v1204_v7  ;;  %v1206_v11 = vunpack.c.h.bf16 %v1204_v7  ;;  %v1154_v20 = vld [vmem:[%s1445_s2 + $0x18] sm:$0xff]  ;;  %v1153_v23 = vld [vmem:[%s1445_s2 + $0x10] sm:$0xff]  ;;  %275 = vst [vmem:[#allocation3 + $0x11] sm:$0x1] %v1233_v28  ;;  %s271_s24 = scalar_lea.vmem %s1449_s6, %s1150_s19 }
  0x10   : > { %386 = vmatpush.bf16.msra.mxu0 %v1165_v3  ;;  %v1201_v12 = vunpack.c.l.bf16 %v1200_v8  ;;  %v1202_v13 = vunpack.c.h.bf16 %v1200_v8  ;;  %v1163_v16 = vld [vmem:[%s1445_s2 + $0x60] sm:$0xff]  ;;  %v1170_v21 = vld [vmem:[%s1445_s2 + $0x98] sm:$0xff]  ;;  %v1169_v24 = vld [vmem:[%s1445_s2 + $0x90] sm:$0xff] }
  0x11   : > { %448 = vmatpush.bf16.msra.mxu1 %v1157_v4  ;;  %v1217_v15 = vpack.i.bf16 %v1206_v11, %v1205_v10  ;;  %v1155_v17 = vld [vmem:[%s1445_s2 + $0x20] sm:$0xff]  ;;  %v1160_v25 = vld [vmem:[%s1445_s2 + $0x48] sm:$0xff]  ;;  %v1190_v44 = vld [vmem:[%s1447_s4 + $0x78] sm:$0xff] }
  0x12   : > { %530 = vmatpush.bf16.msra.mxu2 %v1173_v5  ;;  %281 = vst.msk [vmem:[#allocation2 + $0x1] sm:$0xff] %vm280_vm0, %v1201_v12  ;;  %v1171_v18 = vld [vmem:[%s1445_s2 + $0xa0] sm:$0xff]  ;;  %v1152_v26 = vld [vmem:[%s1445_s2 + $0x8] sm:$0xff]  ;;  %642 = vmatpush.bf16.msra.mxu3 %v1190_v44  ;;  %v1189_v45 = vld [vmem:[%s1447_s4 + $0x70] sm:$0xff] }
  0x13   : > { %282 = vst.msk [vmem:[#allocation2 + $0x9] sm:$0xff] %vm280_vm0, %v1202_v13  ;;  %1218 = vrot.lane.b32.xlu0 %v1217_v15, %s1232_s30  ;;  %v1168_v27 = vld [vmem:[%s1445_s2 + $0x88] sm:$0xff]  ;;  %v1159_v29 = vld [vmem:[%s1445_s2 + $0x40] sm:$0xff]  ;;  %v1182_v46 = vld [vmem:[%s1447_s4 + $0x38] sm:$0xff] }
  0x14   : > { %387 = vmatpush.bf16.msra.mxu0 %v1164_v6  ;;  %v1151_v30 = vld [vmem:[%s1445_s2] sm:$0xff]  ;;  %v1198_v47 = vld [vmem:[%s1447_s4 + $0xb8] sm:$0xff]  ;;  %v1188_v48 = vld [vmem:[%s1447_s4 + $0x68] sm:$0xff] }
  0x15   : > { %449 = vmatpush.bf16.msra.mxu1 %v1156_v9  ;;  %v1167_v31 = vld [vmem:[%s1445_s2 + $0x80] sm:$0xff]  ;;  %v1181_v49 = vld [vmem:[%s1447_s4 + $0x30] sm:$0xff]  ;;  %v1180_v52 = vld [vmem:[%s1447_s4 + $0x28] sm:$0xff] }
  0x16   : > { %531 = vmatpush.bf16.msra.mxu2 %v1172_v14  ;;  %643 = vmatpush.bf16.msra.mxu3 %v1189_v45  ;;  %v1197_v50 = vld [vmem:[%s1447_s4 + $0xb0] sm:$0xff]  ;;  %v1187_v51 = vld [vmem:[%s1447_s4 + $0x60] sm:$0xff]  ;;  %v1196_v53 = vld [vmem:[%s1447_s4 + $0xa8] sm:$0xff] }
  0x17   : > { %v1186_v54 = vld [vmem:[%s1447_s4 + $0x58] sm:$0xff]  ;;  %v1179_v55 = vld [vmem:[%s1447_s4 + $0x20] sm:$0xff]  ;;  %v1185_v57 = vld [vmem:[%s1447_s4 + $0x50] sm:$0xff] }
  0x18   : > { %388 = vmatpush.bf16.msra.mxu0 %v1163_v16  ;;  %v1195_v56 = vld [vmem:[%s1447_s4 + $0xa0] sm:$0xff]  ;;  %v1178_v58 = vld [vmem:[%s1447_s4 + $0x18] sm:$0xff]  ;;  %v1184_v60 = vld [vmem:[%s1447_s4 + $0x48] sm:$0xff] }
  0x19   : > { %450 = vmatpush.bf16.msra.mxu1 %v1155_v17  ;;  %v1194_v59 = vld [vmem:[%s1447_s4 + $0x98] sm:$0xff]  ;;  %v1177_v61 = vld [vmem:[%s1447_s4 + $0x10] sm:$0xff]  ;;  %v1183_v63 = vld [vmem:[%s1447_s4 + $0x40] sm:$0xff] }
  0x1a   : > { %532 = vmatpush.bf16.msra.mxu2 %v1171_v18  ;;  %644 = vmatpush.bf16.msra.mxu3 %v1188_v48  ;;  %v1193_v62 = vld [vmem:[%s1447_s4 + $0x90] sm:$0xff]  ;;  %v1176_v0 = vld [vmem:[%s1447_s4 + $0x8] sm:$0xff]  ;;  %v1175_v2 = vld [vmem:[%s1447_s4] sm:$0xff] }
  0x1b   : > { %v1192_v1 = vld [vmem:[%s1447_s4 + $0x88] sm:$0xff]  ;;  %v1191_v3 = vld [vmem:[%s1447_s4 + $0x80] sm:$0xff] }
  0x1c   : > { %389 = vmatpush.bf16.msra.mxu0 %v1162_v19  ;;  %v1222_v7 = vld [vmem:[%s1446_s3] ss:$0 sm:$0xff] }
  0x1d   : > { %451 = vmatpush.bf16.msra.mxu1 %v1154_v20 }
  0x1e   : > { %533 = vmatpush.bf16.msra.mxu2 %v1170_v21  ;;  %645 = vmatpush.bf16.msra.mxu3 %v1187_v51 }
  0x20   : > { %390 = vmatpush.bf16.msra.mxu0 %v1161_v22 }
  0x21   : > { %452 = vmatpush.bf16.msra.mxu1 %v1153_v23 }
  0x22   : > { %534 = vmatpush.bf16.msra.mxu2 %v1169_v24  ;;  %646 = vmatpush.bf16.msra.mxu3 %v1186_v54 }
  0x24   : > { %391 = vmatpush.bf16.msra.mxu0 %v1160_v25 }
  0x25   : > { %453 = vmatpush.bf16.msra.mxu1 %v1152_v26 }
  0x26   : > { %535 = vmatpush.bf16.msra.mxu2 %v1168_v27  ;;  %647 = vmatpush.bf16.msra.mxu3 %v1185_v57 }
  0x28   : > { %392 = vmatpush.bf16.msra.mxu0 %v1159_v29 }
  0x29   : > { %454 = vmatpush.bf16.msra.mxu1 %v1151_v30  ;;  %v1223_v30 = vld [vmem:[%s1448_s5] ss:$0 sm:$0xff] }
  0x2a   : > { %536 = vmatpush.bf16.msra.mxu2 %v1167_v31  ;;  %648 = vmatpush.bf16.msra.mxu3 %v1184_v60 }
  0x2c   : > { %704 = vmatpush.bf16.msrb.mxu0 %v1182_v46 }
  0x2d   : > { %786 = vmatpush.bf16.msrb.mxu1 %v1198_v47 }
  0x2e   : > { %649 = vmatpush.bf16.msra.mxu3 %v1183_v63 }
  0x30   : > { %705 = vmatpush.bf16.msrb.mxu0 %v1181_v49 }
  0x31   : > { %787 = vmatpush.bf16.msrb.mxu1 %v1197_v50 }
  0x34   : > { %706 = vmatpush.bf16.msrb.mxu0 %v1180_v52 }
  0x35   : > { %788 = vmatpush.bf16.msrb.mxu1 %v1196_v53 }
  0x38   : > { %707 = vmatpush.bf16.msrb.mxu0 %v1179_v55 }
  0x39   : > { %789 = vmatpush.bf16.msrb.mxu1 %v1195_v56 }
  0x3c   : > { %708 = vmatpush.bf16.msrb.mxu0 %v1178_v58 }
  0x3d   : > { %790 = vmatpush.bf16.msrb.mxu1 %v1194_v59 }
  0x40   : > { %709 = vmatpush.bf16.msrb.mxu0 %v1177_v61 }
  0x41   : > { %791 = vmatpush.bf16.msrb.mxu1 %v1193_v62 }
  0x44   : > { %710 = vmatpush.bf16.msrb.mxu0 %v1176_v0 }
  0x45   : > { %792 = vmatpush.bf16.msrb.mxu1 %v1192_v1 }
  0x48   : > { %711 = vmatpush.bf16.msrb.mxu0 %v1175_v2 }
  0x49   : > { %793 = vmatpush.bf16.msrb.mxu1 %v1191_v3 }
  0x85   : > { %v1219_v32 = vpop.permute.xlu0 %1218 }
  0x86   : > { %v1221_v33 = vunpack.i.h.bf16 %v1219_v32  ;;  %v1220_v34 = vunpack.i.l.bf16 %v1219_v32 }
  0x88   : > { %296 = vst.msk [vmem:[#allocation2 + $0x1] sm:$0xff] %vm295_vm1, %v1220_v34 }
  0x89   : > { %297 = vst.msk [vmem:[#allocation2 + $0x9] sm:$0xff] %vm295_vm1, %v1221_v33 }
  0x8f   : > { %v317_v35 = vld [vmem:[#allocation2 + $0x1] sm:$0xff] }
  0x90   : > { %v298_v36 = vld [vmem:[#allocation2] sm:$0xff]  ;;  %v318_v37 = vld [vmem:[#allocation2 + $0x9] sm:$0xff] }
  0x91   : > { %v299_v38 = vld [vmem:[#allocation2 + $0x8] sm:$0xff]  ;;  %v319_v40 = vpack.c.bf16 %v318_v37, %v317_v35 }
  0x92   : > { %v461_v39 = vld [vmem:[#allocation2 + $0x2] sm:$0xff]  ;;  %v300_v41 = vpack.c.bf16 %v299_v38, %v298_v36  ;;  %v462_v42 = vld [vmem:[#allocation2 + $0xa] sm:$0xff] }
  0x93   : > { %v463_v43 = vpack.c.bf16 %v462_v42, %v461_v39  ;;  %393 = vmatmul.bf16.vlgmr.msra.gmra.mxu0 %v319_v40 }
  0x94   : > { %455 = vmatmul.bf16.vlgmr.msra.gmra.mxu1 %v300_v41 }
  0x95   : > { %537 = vmatmul.bf16.vlgmr.msra.gmra.mxu2 %v463_v43 }
 0x110   : > { %v394_v4 = vpop.f32.mrf.mxu0 }
 0x111   : > { %v456_v5 = vpop.f32.mrf.mxu1 }
 0x112   : > { %v457_v6 = vadd.f32 %v456_v5, %v394_v4 }
 0x118   : > { %v538_v8 = vpop.f32.mrf.mxu2  ;;  %v396_v11 = vpop.f32.mrf.mxu0 }
 0x119   : > { %v543_v9 = vadd.f32 %v538_v8, %v457_v6  ;;  %v458_v12 = vpop.f32.mrf.mxu1 }
 0x11a   : > { %v459_v14 = vadd.f32 %v458_v12, %v396_v11 }
 0x11b   : > { %v549_v10 = vadd.f32 %v1222_v7, %v543_v9 }
 0x11d   : > { %v551_v13 = vmax.f32 %v549_v10, 0.0 }
 0x11f   : > { %553 = vst [vmem:[#allocation3 + $0x1] sm:$0xff] %v551_v13 }
 0x120   : > { %v540_v15 = vpop.f32.mrf.mxu2 }
 0x121   : > { %v544_v16 = vadd.f32 %v540_v15, %v459_v14 }
 0x123   : > { %v550_v17 = vadd.f32 %v1222_v7, %v544_v16 }
 0x125   : > { %v552_v18 = vmax.f32 %v550_v17, 0.0 }
 0x126   : > { %v555_v20 = vld [vmem:[#allocation3] sm:$0xff] }
 0x127   : > { %554 = vst [vmem:[#allocation3 + $0x9] sm:$0xff] %v552_v18  ;;  %v576_v19 = vpack.c.bf16 %v552_v18, %v551_v13 }
 0x129   : > { %650 = vmatmul.bf16.vlgmr.msra.gmra.mxu3 %v576_v19 }
 0x12e   : > { %v556_v21 = vld [vmem:[#allocation3 + $0x8] sm:$0xff] }
 0x12f   : > { %v718_v22 = vld [vmem:[#allocation3 + $0x2] sm:$0xff]  ;;  %v719_v23 = vld [vmem:[#allocation3 + $0xa] sm:$0xff]  ;;  %v557_v24 = vpack.c.bf16 %v556_v21, %v555_v20 }
 0x130   : > { %v720_v25 = vpack.c.bf16 %v719_v23, %v718_v22 }
 0x131   : > { %712 = vmatmul.bf16.vlgmr.msrb.gmra.mxu0 %v557_v24 }
 0x132   : > { %794 = vmatmul.bf16.vlgmr.msrb.gmra.mxu1 %v720_v25 }
 0x1ac   : > { %v651_v26 = vpop.f32.mrf.mxu3 }
 0x1ae   : > { %v713_v27 = vpop.f32.mrf.mxu0 }
 0x1af   : > { %v795_v28 = vpop.f32.mrf.mxu1  ;;  %v714_v29 = vadd.f32 %v713_v27, %v651_v26 }
 0x1b1   : > { %v800_v31 = vadd.f32 %v795_v28, %v714_v29 }
 0x1b3   : > { %v806_v32 = vadd.f32 %v1223_v30, %v800_v31 }
 0x1b4   : > { %v653_v35 = vpop.f32.mrf.mxu3 }
 0x1b5   : > { %v808_v33 = vmax.f32 %v806_v32, 0.0 }
 0x1b6   : > { %v715_v34 = vpop.f32.mrf.mxu0 }
 0x1b7   : > { %810 = vst [vmem:[%s271_s24] sm:$0xff] %v808_v33  ;;  %v716_v36 = vadd.f32 %v715_v34, %v653_v35  ;;  %v797_v37 = vpop.f32.mrf.mxu1 }
 0x1b9   : > { %v801_v38 = vadd.f32 %v797_v37, %v716_v36 }
 0x1bb   : > { %v807_v39 = vadd.f32 %v1223_v30, %v801_v38 }
 0x1bd   : > { %v809_v40 = vmax.f32 %v807_v39, 0.0 }
 0x1bf   : > { %811 = vst [vmem:[%s271_s24 + $0x8] sm:$0xff] %v809_v40 }
 0x1c0 PF: > { %s16_s21 = sadd.s32 1, %s1230_s21  }
 0x1c1   : > { %p13_p4 = scmp.ge.s32.totalorder %s16_s21, 4  }
 0x1c3   :  { %15 = sbr.rel (!%p13_p4) target bundleno = 1 (0x1), region = 81 }

</bundles_post_ra>
